<compile_context>
chip_gen: v7x
topology: tpu7x:2x2x1
jax: 0.10.0
libtpu: 0.0.40
codegen_flags: <defaults>
</compile_context>

<pallas_src>
import jax
import jax.numpy as jnp
from jax.experimental import pallas as pl
from jax.experimental.pallas import tpu as pltpu

LANE = 128
SUBLANE = 8


def _round_up(n, m):
    return (n + m - 1) // m * m


def mlp_kernel(x_ref, w1_ref, b1_ref, w2_ref, b2_ref, w3_ref, b3_ref, o_ref):
    # In-kernel cast of x to the MXU dtype (no separate XLA pass over x).
    x = x_ref[...].astype(w1_ref.dtype)
    # fc1 + ReLU  (bf16 MXU operands, f32 accumulate; elementwise stays f32)
    h1 = jnp.dot(x, w1_ref[...], preferred_element_type=jnp.float32)
    h1 = jnp.maximum(h1 + b1_ref[...], 0.0)
    # fc2 + ReLU
    h2 = jnp.dot(h1.astype(w2_ref.dtype), w2_ref[...],
                 preferred_element_type=jnp.float32)
    h2 = jnp.maximum(h2 + b2_ref[...], 0.0)
    # out (no activation): 128-wide f32 accumulator in VMEM, narrow store.
    o = jnp.dot(h2.astype(w3_ref.dtype), w3_ref[...],
                preferred_element_type=jnp.float32)
    o = o + b3_ref[...]
    o_ref[...] = o[:, :o_ref.shape[-1]].astype(o_ref.dtype)


def mlp_forward(x, w1, b1, w2, b2, w3, b3, *, block_batch=2048,
                compute_dtype=jnp.bfloat16):
    """y = relu(relu(x@w1+b1)@w2+b2)@w3+b3, as one gridded Pallas kernel.

    Weights are stored [in_features, out_features]; biases are [1, out].
    """
    batch, feat_in = x.shape
    out_features = w3.shape[1]

    # ---- pad params once (zeros; mathematically inert through ReLU) ----
    h1p = LANE   # 25 -> 128
    h2p = LANE   # 30 -> 128
    op = LANE    # 3  -> 128 (in-kernel accumulator width only)

    # w1 padded only along N; K stays 4 and x is passed unpadded/uncast.
    w1p = jnp.pad(w1, ((0, 0), (0, h1p - w1.shape[1]))).astype(compute_dtype)
    b1p = jnp.pad(b1, ((0, 0), (0, h1p - b1.shape[1]))).astype(jnp.float32)
    w2p = jnp.pad(w2, ((0, h1p - w2.shape[0]), (0, h2p - w2.shape[1]))
                  ).astype(compute_dtype)
    b2p = jnp.pad(b2, ((0, 0), (0, h2p - b2.shape[1]))).astype(jnp.float32)
    w3p = jnp.pad(w3, ((0, h2p - w3.shape[0]), (0, op - w3.shape[1]))
                  ).astype(compute_dtype)
    b3p = jnp.pad(b3, ((0, 0), (0, op - b3.shape[1]))).astype(jnp.float32)

    # ---- batch tiling: multiple-of-8 tiles, no wrapper batch padding ----
    rows8 = _round_up(batch, SUBLANE)
    tb = min(_round_up(block_batch, SUBLANE), rows8)
    # v7x: make sure the grid has >= 2 steps when there is enough work so the
    # "parallel" batch axis shards across both TensorCores.
    if pl.cdiv(rows8, tb) < 2 and rows8 >= 2 * SUBLANE:
        tb = _round_up(pl.cdiv(rows8, 2), SUBLANE)
    grid = (pl.cdiv(batch, tb),)

    batch_spec = lambda cols: pl.BlockSpec((tb, cols), lambda i: (i, 0))
    resident = lambda shape: pl.BlockSpec(shape, lambda i: (0, 0))

    out = pl.pallas_call(
        mlp_kernel,
        out_shape=jax.ShapeDtypeStruct((batch, out_features), jnp.float32),
        grid=grid,
        in_specs=[
            batch_spec(feat_in),
            resident(w1p.shape), resident(b1p.shape),
            resident(w2p.shape), resident(b2p.shape),
            resident(w3p.shape), resident(b3p.shape),
        ],
        out_specs=batch_spec(out_features),
        compiler_params=pltpu.CompilerParams(
            dimension_semantics=("parallel",),
            vmem_limit_bytes=32 * 1024 * 1024),
    )(x, w1p, b1p, w2p, b2p, w3p, b3p)

    return out


def init_params(key, input_features=4, hidden1=25, hidden2=30,
                output_features=3):
    """Deterministic PyTorch-style (uniform +/- 1/sqrt(fan_in)) init."""
    ks = jax.random.split(key, 6)

    def linear(kw, kb, fan_in, fan_out):
        bound = 1.0 / jnp.sqrt(fan_in)
        # stored as [in, out] so the kernel computes x @ W
        w = jax.random.uniform(kw, (fan_in, fan_out), jnp.float32, -bound, bound)
        b = jax.random.uniform(kb, (1, fan_out), jnp.float32, -bound, bound)
        return w, b

    w1, b1 = linear(ks[0], ks[1], input_features, hidden1)
    w2, b2 = linear(ks[2], ks[3], hidden1, hidden2)
    w3, b3 = linear(ks[4], ks[5], hidden2, output_features)
    return w1, b1, w2, b2, w3, b3


if __name__ == "__main__":
    key = jax.random.PRNGKey(0)
    k_x, k_p = jax.random.split(key)

    batch = 8
    x = jax.random.normal(k_x, (batch, 4), dtype=jnp.float32)
    params = init_params(k_p)

    out = mlp_forward(x, *params)
    out = jax.block_until_ready(out)

    # Reference check in plain JAX (f32). bf16 MXU operands => loose tolerance.
    w1, b1, w2, b2, w3, b3 = params
    ref = jnp.maximum(x @ w1 + b1, 0.0)
    ref = jnp.maximum(ref @ w2 + b2, 0.0)
    ref = ref @ w3 + b3
    assert out.shape == (batch, 3)
    assert jnp.allclose(out, ref, atol=2e-2, rtol=2e-2), (
        f"max abs err {jnp.max(jnp.abs(out - ref))}")

    print("KERNEL_OK")
</pallas_src>

<mosaic_0001>
module attributes {stable_mosaic.version = 11 : i64} {
  func.func @mlp_kernel(%arg0: i32, %arg1: memref<8x4xf32, #tpu.memory_space<vmem>>, %arg2: memref<4x128xbf16, #tpu.memory_space<vmem>>, %arg3: memref<1x128xf32, #tpu.memory_space<vmem>>, %arg4: memref<128x128xbf16, #tpu.memory_space<vmem>>, %arg5: memref<1x128xf32, #tpu.memory_space<vmem>>, %arg6: memref<128x128xbf16, #tpu.memory_space<vmem>>, %arg7: memref<1x128xf32, #tpu.memory_space<vmem>>, %arg8: memref<8x3xf32, #tpu.memory_space<vmem>>) attributes {dimension_semantics = [#tpu.dimension_semantics<parallel>], iteration_bounds = array<i64: 1>, scalar_prefetch = 0 : i64, scratch_operands = 0 : i64, tpu.core_type = #tpu.core_type<tc>, window_params = [{transform_indices = @transform_0, window_bounds = array<i64: 8, 4>}, {pipeline_mode = #tpu.pipeline_mode<synchronous>, transform_indices = @transform_1, window_bounds = array<i64: 4, 128>}, {pipeline_mode = #tpu.pipeline_mode<synchronous>, transform_indices = @transform_2, window_bounds = array<i64: 1, 128>}, {pipeline_mode = #tpu.pipeline_mode<synchronous>, transform_indices = @transform_3, window_bounds = array<i64: 128, 128>}, {pipeline_mode = #tpu.pipeline_mode<synchronous>, transform_indices = @transform_4, window_bounds = array<i64: 1, 128>}, {pipeline_mode = #tpu.pipeline_mode<synchronous>, transform_indices = @transform_5, window_bounds = array<i64: 128, 128>}, {pipeline_mode = #tpu.pipeline_mode<synchronous>, transform_indices = @transform_6, window_bounds = array<i64: 1, 128>}, {transform_indices = @transform_7, window_bounds = array<i64: 8, 3>}]} {
    %c0 = arith.constant 0 : index
    %c0_0 = arith.constant 0 : index
    %0 = vector.load %arg1[%c0, %c0_0] : memref<8x4xf32, #tpu.memory_space<vmem>>, vector<8x4xf32>
    %1 = arith.truncf %0 : vector<8x4xf32> to vector<8x4xbf16>
    %c0_1 = arith.constant 0 : index
    %c0_2 = arith.constant 0 : index
    %2 = vector.load %arg2[%c0_1, %c0_2] : memref<4x128xbf16, #tpu.memory_space<vmem>>, vector<4x128xbf16>
    %cst = arith.constant dense<0.000000e+00> : vector<8x128xf32>
    %3 = tpu.matmul %1, %2, %cst {dimension_numbers = #tpu.dot_dimension_numbers<[1], [0], [0], [1], [0, 0, 1, 1], [], []>} : vector<8x4xbf16>, vector<4x128xbf16>, vector<8x128xf32> -> vector<8x128xf32>
    %c0_3 = arith.constant 0 : index
    %c0_4 = arith.constant 0 : index
    %4 = vector.load %arg3[%c0_3, %c0_4] : memref<1x128xf32, #tpu.memory_space<vmem>>, vector<1x128xf32>
    %5 = vector.broadcast %4 : vector<1x128xf32> to vector<8x128xf32>
    %6 = arith.addf %3, %5 : vector<8x128xf32>
    %cst_5 = arith.constant 0.000000e+00 : f32
    %7 = vector.broadcast %cst_5 : f32 to vector<8x128xf32>
    %8 = arith.maximumf %6, %7 : vector<8x128xf32>
    %9 = arith.truncf %8 : vector<8x128xf32> to vector<8x128xbf16>
    %c0_6 = arith.constant 0 : index
    %c0_7 = arith.constant 0 : index
    %10 = vector.load %arg4[%c0_6, %c0_7] : memref<128x128xbf16, #tpu.memory_space<vmem>>, vector<128x128xbf16>
    %cst_8 = arith.constant dense<0.000000e+00> : vector<8x128xf32>
    %11 = tpu.matmul %9, %10, %cst_8 {dimension_numbers = #tpu.dot_dimension_numbers<[1], [0], [0], [1], [0, 0, 1, 1], [], []>} : vector<8x128xbf16>, vector<128x128xbf16>, vector<8x128xf32> -> vector<8x128xf32>
    %c0_9 = arith.constant 0 : index
    %c0_10 = arith.constant 0 : index
    %12 = vector.load %arg5[%c0_9, %c0_10] : memref<1x128xf32, #tpu.memory_space<vmem>>, vector<1x128xf32>
    %13 = vector.broadcast %12 : vector<1x128xf32> to vector<8x128xf32>
    %14 = arith.addf %11, %13 : vector<8x128xf32>
    %cst_11 = arith.constant 0.000000e+00 : f32
    %15 = vector.broadcast %cst_11 : f32 to vector<8x128xf32>
    %16 = arith.maximumf %14, %15 : vector<8x128xf32>
    %17 = arith.truncf %16 : vector<8x128xf32> to vector<8x128xbf16>
    %c0_12 = arith.constant 0 : index
    %c0_13 = arith.constant 0 : index
    %18 = vector.load %arg6[%c0_12, %c0_13] : memref<128x128xbf16, #tpu.memory_space<vmem>>, vector<128x128xbf16>
    %cst_14 = arith.constant dense<0.000000e+00> : vector<8x128xf32>
    %19 = tpu.matmul %17, %18, %cst_14 {dimension_numbers = #tpu.dot_dimension_numbers<[1], [0], [0], [1], [0, 0, 1, 1], [], []>} : vector<8x128xbf16>, vector<128x128xbf16>, vector<8x128xf32> -> vector<8x128xf32>
    %c0_15 = arith.constant 0 : index
    %c0_16 = arith.constant 0 : index
    %20 = vector.load %arg7[%c0_15, %c0_16] : memref<1x128xf32, #tpu.memory_space<vmem>>, vector<1x128xf32>
    %21 = vector.broadcast %20 : vector<1x128xf32> to vector<8x128xf32>
    %22 = arith.addf %19, %21 : vector<8x128xf32>
    %23 = vector.extract_strided_slice %22 {offsets = [0, 0], sizes = [8, 3], strides = [1, 1]} : vector<8x128xf32> to vector<8x3xf32>
    %c0_17 = arith.constant 0 : index
    %c0_18 = arith.constant 0 : index
    %24 = vector.load %arg8[%c0_17, %c0_18] : memref<8x3xf32, #tpu.memory_space<vmem>>, vector<8x3xf32>
    tpu.vector_store %arg8[%c0_17, %c0_18], %23 {strides = array<i32>} : memref<8x3xf32, #tpu.memory_space<vmem>>, vector<8x3xf32>,
    return
  }
  func.func @transform_0(%arg0: i32) -> (i32, i32) {
    %c0_i32 = arith.constant 0 : i32
    %c0_i32_0 = arith.constant 0 : i32
    return %arg0, %c0_i32 : i32, i32
  }
  func.func @transform_1(%arg0: i32) -> (i32, i32) {
    %c0_i32 = arith.constant 0 : i32
    %c0_i32_0 = arith.constant 0 : i32
    %c0_i32_1 = arith.constant 0 : i32
    return %c0_i32, %c0_i32_0 : i32, i32
  }
  func.func @transform_2(%arg0: i32) -> (i32, i32) {
    %c0_i32 = arith.constant 0 : i32
    %c0_i32_0 = arith.constant 0 : i32
    %c0_i32_1 = arith.constant 0 : i32
    return %c0_i32, %c0_i32_0 : i32, i32
  }
  func.func @transform_3(%arg0: i32) -> (i32, i32) {
    %c0_i32 = arith.constant 0 : i32
    %c0_i32_0 = arith.constant 0 : i32
    %c0_i32_1 = arith.constant 0 : i32
    return %c0_i32, %c0_i32_0 : i32, i32
  }
  func.func @transform_4(%arg0: i32) -> (i32, i32) {
    %c0_i32 = arith.constant 0 : i32
    %c0_i32_0 = arith.constant 0 : i32
    %c0_i32_1 = arith.constant 0 : i32
    return %c0_i32, %c0_i32_0 : i32, i32
  }
  func.func @transform_5(%arg0: i32) -> (i32, i32) {
    %c0_i32 = arith.constant 0 : i32
    %c0_i32_0 = arith.constant 0 : i32
    %c0_i32_1 = arith.constant 0 : i32
    return %c0_i32, %c0_i32_0 : i32, i32
  }
  func.func @transform_6(%arg0: i32) -> (i32, i32) {
    %c0_i32 = arith.constant 0 : i32
    %c0_i32_0 = arith.constant 0 : i32
    %c0_i32_1 = arith.constant 0 : i32
    return %c0_i32, %c0_i32_0 : i32, i32
  }
  func.func @transform_7(%arg0: i32) -> (i32, i32) {
    %c0_i32 = arith.constant 0 : i32
    %c0_i32_0 = arith.constant 0 : i32
    return %arg0, %c0_i32 : i32, i32
  }
}

</mosaic_0001>

<bundles_post_ra>
// kernel: tpu_custom_call.1
= control target key start
LH: loop header
LB: loop body
LE: loop exit
PB: predicated region body
PF: predicated region fallthrough
CT: control target
= control target key end

     0   :  { %12 = vsyncpa [#allocation3], 0  ;;  %s614_s0 = inlined_call_operand.vmem [shape: f32[8,4], index: 0, kind: input, shape index: {}]   ;;  %s615_s1 = inlined_call_operand.vmem [shape: bf16[4,128], index: 1, kind: input, shape index: {}]   ;;  %s616_s2 = inlined_call_operand.vmem [shape: f32[1,128], index: 2, kind: input, shape index: {}]   ;;  %s617_s3 = inlined_call_operand.hbm [shape: bf16[128,128], index: 3, kind: input, shape index: {}]   ;;  %s618_s4 = inlined_call_operand.vmem [shape: f32[1,128], index: 4, kind: input, shape index: {}]   ;;  %s619_s5 = inlined_call_operand.hbm [shape: bf16[128,128], index: 5, kind: input, shape index: {}]   ;;  %s620_s6 = inlined_call_operand.vmem [shape: f32[1,128], index: 6, kind: input, shape index: {}]   ;;  %s621_s7 = inlined_call_operand.vmem [shape: f32[8,3], index: 7, kind: output, shape index: {}]  }
   0x1   :  { %13 = vsyncpa [#allocation5], 0  ;;  %s503_s24 = smov [#allocation2]   ;;  %s455_s28 = scalar_lea.hbm %s617_s3, 1024 }
   0x2   :  { %s25_s25 = sshll.u32 %s503_s24, 4  ;;  %p456_p0 = scmp.ne.s32.totalorder %s617_s3, %s455_s28  ;;  %s26_s25 = int_to_ptr.vmem [resolvable:$true] %s25_s25 }
   0x3   :  { %p459_p1 = scmp.lt.u32.totalorder %s455_s28, %s617_s3 }
   0x5   :  { %p461_p2 = pnand %p459_p1, %p456_p0 }
   0x7   :  { %464 = shalt.err (!%p461_p2)
}
   0x8   :  { %s465_s10 = scalar_lea.vmem %s26_s25, 1024  ;;  %p470_p4 = scmp.lt.s32.totalorder %s26_s25, %s26_s25 }
   0x9   :  { %p466_p3 = scmp.ne.s32.totalorder %s26_s25, %s465_s10  ;;  %p471_p5 = scmp.lt.s32.totalorder %s465_s10, %s465_s10 }
   0xb   :  { %p472_p6 = por %p471_p5, %p470_p4 }
   0xd   :  { %p473_p7 = pnand %p472_p6, %p466_p3 }
   0xf   :  { %476 = shalt.err (!%p473_p7)
}
  0x10   :  { %s504_s11 = smov 64   ;;  %s505_s12 = smov 4  }
  0x11   :  { %31 = dma.hbm_to_vmem [thread:$0]  %s617_s3, 1024, %s26_s25, [#allocation3], %s504_s11, %s504_s11, %s505_s12  }
  0x12   :  { %s506_s15 = smov [#allocation4]   ;;  %s477_s19 = scalar_lea.hbm %s619_s5, 1024 }
  0x13   :  { %s39_s16 = sshll.u32 %s506_s15, 4  ;;  %p478_p8 = scmp.ne.s32.totalorder %s619_s5, %s477_s19  ;;  %s40_s16 = int_to_ptr.vmem [resolvable:$true] %s39_s16 }
  0x14   :  { %p481_p9 = scmp.lt.u32.totalorder %s477_s19, %s619_s5 }
  0x16   :  { %p483_p10 = pnand %p481_p9, %p478_p8 }
  0x18   :  { %486 = shalt.err (!%p483_p10)
}
  0x19   :  { %s487_s24 = scalar_lea.vmem %s40_s16, 1024  ;;  %p492_p12 = scmp.lt.s32.totalorder %s40_s16, %s40_s16 }
  0x1a   :  { %p488_p11 = scmp.ne.s32.totalorder %s40_s16, %s487_s24  ;;  %p493_p13 = scmp.lt.s32.totalorder %s487_s24, %s487_s24 }
  0x1c   :  { %p494_p0 = por %p493_p13, %p492_p12 }
  0x1e   :  { %p495_p1 = pnand %p494_p0, %p488_p11 }
  0x20   :  { %498 = shalt.err (!%p495_p1)
}
  0x21   :  { %45 = dma.hbm_to_vmem [thread:$0]  %s619_s5, 1024, %s40_s16, [#allocation5], %s504_s11, %s504_s11, %s505_s12  }
  0x22   :  { %499 = dma.done.wait [#allocation3], 1024  }
  0x23   :  { %500 = vsyncadd [#allocation3], 4294966272 }
  0x24   :  { %501 = dma.done.wait [#allocation5], 1024  }
  0x25   :  { %502 = vsyncadd [#allocation5], 4294966272  ;;  %v507_v0 = vmov 0.0   ;;  %vm508_vm0 = vmmov 0   ;;  %vm69_vm1 = vcmask 1041408   ;;  %v55_v2 = vld [vmem:[%s614_s0] sm:$0xff] }
  0x26   :  { %387 = vmatprep.subr.bf16.mxu0 %v507_v0  ;;  %389 = vmatprep.mubr.msk.bf16.mxu0 %vm508_vm0, %v507_v0  ;;  %v57_v1 = vld [vmem:[%s615_s1] sm:$0x3]  ;;  %v56_v4 = vpack.c.bf16 %v55_v2, %v55_v2  ;;  %vm65_vm2 = vcmask 31744   ;;  %v440_v6 = vld [vmem:[#allocation2 + $0x8] sm:$0xff]   ;;  %v441_v7 = vld [vmem:[#allocation2 + $0x10] sm:$0xff]   ;;  %vm339_vm3 = vcmask 23552  }
  0x27   :  { %393 = vmatprep.subr.bf16.mxu1 %v507_v0  ;;  %409 = vmatprep.mubr.msk.bf16.mxu1 %vm508_vm0, %v507_v0  ;;  %v71_v3 = vsel %vm69_vm1, %v57_v1, 0  ;;  %v439_v5 = vld [vmem:[#allocation2] sm:$0xff]   ;;  %v442_v8 = vld [vmem:[#allocation2 + $0x18] sm:$0xff]   ;;  %v444_v10 = vld [vmem:[#allocation2 + $0x28] sm:$0xff]  }
  0x28   :  { %388 = vmatpush3.bf16.msra.mxu0 %v71_v3  ;;  %394 = vmatpush3.bf16.msra.mxu1 %v439_v5  ;;  %v443_v9 = vld [vmem:[#allocation2 + $0x20] sm:$0xff]   ;;  %v445_v11 = vld [vmem:[#allocation2 + $0x30] sm:$0xff]   ;;  %v446_v12 = vld [vmem:[#allocation2 + $0x38] sm:$0xff]  }
  0x29   :  { %413 = vmatprep.subr.bf16.mxu0 %v507_v0  ;;  %395 = vmatprep.subr.bf16.mxu1 %v507_v0  ;;  %v447_v13 = vld [vmem:[#allocation4] sm:$0xff]   ;;  %v448_v14 = vld [vmem:[#allocation4 + $0x8] sm:$0xff]   ;;  %v449_v15 = vld [vmem:[#allocation4 + $0x10] sm:$0xff]  }
  0x2a   :  { %v450_v16 = vld [vmem:[#allocation4 + $0x18] sm:$0xff]   ;;  %v451_v17 = vld [vmem:[#allocation4 + $0x20] sm:$0xff]   ;;  %v452_v18 = vld [vmem:[#allocation4 + $0x28] sm:$0xff]  }
  0x2b   :  { %390 = vmatmul.mubr.msk.bf16.vlgmr.msra.gmra.mrb[0].mxu0 %vm65_vm2, %v56_v4  ;;  %v347_v19 = vld [vmem:[%s616_s2] ss:$0 sm:$0xff]  ;;  %v453_v27 = vld [vmem:[#allocation4 + $0x30] sm:$0xff]   ;;  %v454_v28 = vld [vmem:[#allocation4 + $0x38] sm:$0xff]  }
  0x2c   :  { %429 = vmatprep.mubr.msk.bf16.mxu0 %vm508_vm0, %v507_v0  ;;  %396 = vmatpush3.bf16.msra.mxu1 %v440_v6  ;;  %v349_v29 = vld [vmem:[%s618_s4] ss:$0 sm:$0xff] }
  0x2d   :  { %397 = vmatprep.subr.bf16.mxu1 %v507_v0  ;;  %414 = vmatpush3.bf16.msra.mxu0 %v447_v13  ;;  %v358_v37 = vld [vmem:[%s620_s6] ss:$0 sm:$0xff] }
  0x2e   :  { %415 = vmatprep.subr.bf16.mxu0 %v507_v0 }
  0x30   :  { %398 = vmatpush3.bf16.msra.mxu1 %v441_v7 }
  0x31   :  { %399 = vmatprep.subr.bf16.mxu1 %v507_v0  ;;  %416 = vmatpush3.bf16.msra.mxu0 %v448_v14 }
  0x32   :  { %417 = vmatprep.subr.bf16.mxu0 %v507_v0 }
  0x34   :  { %400 = vmatpush3.bf16.msra.mxu1 %v442_v8 }
  0x35   :  { %401 = vmatprep.subr.bf16.mxu1 %v507_v0  ;;  %418 = vmatpush3.bf16.msra.mxu0 %v449_v15 }
  0x36   :  { %419 = vmatprep.subr.bf16.mxu0 %v507_v0 }
  0x38   :  { %402 = vmatpush3.bf16.msra.mxu1 %v443_v9 }
  0x39   :  { %403 = vmatprep.subr.bf16.mxu1 %v507_v0  ;;  %420 = vmatpush3.bf16.msra.mxu0 %v450_v16 }
  0x3a   :  { %421 = vmatprep.subr.bf16.mxu0 %v507_v0 }
  0x3c   :  { %404 = vmatpush3.bf16.msra.mxu1 %v444_v10 }
  0x3d   :  { %405 = vmatprep.subr.bf16.mxu1 %v507_v0  ;;  %422 = vmatpush3.bf16.msra.mxu0 %v451_v17 }
  0x3e   :  { %423 = vmatprep.subr.bf16.mxu0 %v507_v0 }
  0x40   :  { %406 = vmatpush3.bf16.msra.mxu1 %v445_v11 }
  0x41   :  { %407 = vmatprep.subr.bf16.mxu1 %v507_v0  ;;  %424 = vmatpush3.bf16.msra.mxu0 %v452_v18 }
  0x42   :  { %425 = vmatprep.subr.bf16.mxu0 %v507_v0 }
  0x44   :  { %408 = vmatpush3.bf16.msra.mxu1 %v446_v12 }
  0x45   :  { %426 = vmatpush3.bf16.msra.mxu0 %v453_v27 }
  0x46   :  { %427 = vmatprep.subr.bf16.mxu0 %v507_v0 }
  0x49   :  { %428 = vmatpush3.bf16.msra.mxu0 %v454_v28 }
  0xfe   :  { %v107_v20 = vpop.f32.mrb[0].mxu0 }
  0xff   :  { %v108_v21 = vadd.f32 %v347_v19, %v107_v20  ;;  %v391_v22 = vpop.f32.mrb[1].mxu0 }
 0x100   :  { %v110_v23 = vpop.f32.mrb[2].mxu0 }
 0x101   :  { %v113_v24 = vmax.f32 %v108_v21, 0.0  ;;  %v392_v25 = vpop.f32.mrb[3].mxu0 }
 0x103   :  { %v114_v26 = vpack.c.bf16 %v113_v24, %v113_v24 }
 0x105   :  { %410 = vmatmul.mubr.bf16.vlgmr.msra.gmra.mrb[0].mxu1 %v114_v26 }
 0x1d8   :  { %v220_v30 = vpop.f32.mrb[0].mxu1 }
 0x1d9   :  { %v221_v31 = vadd.f32 %v349_v29, %v220_v30  ;;  %v411_v32 = vpop.f32.mrb[1].mxu1 }
 0x1da   :  { %v223_v33 = vpop.f32.mrb[2].mxu1 }
 0x1db   :  { %v226_v34 = vmax.f32 %v221_v31, 0.0  ;;  %v412_v35 = vpop.f32.mrb[3].mxu1 }
 0x1dd   :  { %v227_v36 = vpack.c.bf16 %v226_v34, %v226_v34 }
 0x1df   :  { %430 = vmatmul.mubr.bf16.vlgmr.msra.gmra.mrb[4].mxu0 %v227_v36 }
 0x2b2   :  { %v333_v38 = vpop.f32.mrb[4].mxu0 }
 0x2b3   :  { %v334_v39 = vadd.f32 %v358_v37, %v333_v38  ;;  %v431_v40 = vpop.f32.mrb[5].mxu0 }
 0x2b4   :  { %v336_v41 = vpop.f32.mrb[6].mxu0 }
 0x2b5   :  { %340 = vst.msk [vmem:[%s621_s7] sm:$0xff] %vm339_vm3, %v334_v39  ;;  %v432_v42 = vpop.f32.mrb[7].mxu0 }
 0x2b6   :  { %345 = vsyncpa [#allocation3], 1 }
 0x2b7   :  { %346 = vsyncpa [#allocation5], 1 }

</bundles_post_ra>
